<compile_context>
chip_gen: v5e
topology: v5e:2x2
jax: 0.10.0
libtpu: 0.0.40
codegen_flags: <defaults>
</compile_context>

<pallas_src>
import functools

import jax
import jax.numpy as jnp
from jax.experimental import pallas as pl
from jax.experimental.pallas import tpu as pltpu


def _rup(x, m):
    return (x + m - 1) // m * m


def _mosaic_params(est_bytes, n_parallel_axes=1):
    # Raise the scoped-VMEM cap only when the tile plan actually needs it.
    vmem = None
    if est_bytes > 8 * 1024 * 1024:
        vmem = min(int(est_bytes * 1.5), 96 * 1024 * 1024)
    return pltpu.CompilerParams(
        dimension_semantics=("parallel",) * n_parallel_axes,
        vmem_limit_bytes=vmem)


# ---------------------------------------------------------------------------
# Pallas kernels
# ---------------------------------------------------------------------------
def _conv_fold_kernel(*refs, K, Wp, L, Cin_k, Cout_k, Lout, off_out, res_off,
                      has_pre, has_post, has_res, emit_padded):
    """KxK stride-1 conv: taps folded into the contraction dim (one MXU dot).

    Per batch element:
      x_ref : (1, Cin_k, Lin)  bf16 zero-padded flattened image,
              Lin = Hp*Wp + K - 1.
      w_ref : (Cout_k, K*K*Cin_k) bf16 (tap-major, cin fastest).
      b_ref : (Cout_k, 1) f32.
      m_ref : (1, L) f32 column-validity mask (L = H*Wp).
      [pre_ref]  : (Cin_k, 1)  f32 fused input PReLU/LeakyReLU slopes.
      [post_ref] : (Cout_k, 1) f32 fused output PReLU/LeakyReLU slopes.
      [res_ref]  : (1, Cout_k, Lin) bf16 residual in padded-flat layout.
      o_ref : (1, Cout_k, Lout) -- either padded-flat (next conv's input) or
              the valid flattened output (Lout = L).
      xs_ref: VMEM scratch (K*K*Cin_k, L) -- stacked RHS.
    """
    x_ref, w_ref, b_ref, m_ref = refs[0], refs[1], refs[2], refs[3]
    idx = 4
    pre_ref = None
    if has_pre:
        pre_ref = refs[idx]; idx += 1
    post_ref = None
    if has_post:
        post_ref = refs[idx]; idx += 1
    res_ref = None
    if has_res:
        res_ref = refs[idx]; idx += 1
    o_ref = refs[idx]
    xs_ref = refs[idx + 1]

    cdt = x_ref.dtype
    # Build the stacked RHS (tap-major) in VMEM; fuse the input activation.
    for ky in range(K):
        for kx in range(K):
            t = ky * K + kx
            s = ky * Wp + kx
            sl = x_ref[0, :, s:s + L]                       # (Cin_k, L)
            if has_pre:
                slf = sl.astype(jnp.float32)
                slf = jnp.where(slf >= 0.0, slf, pre_ref[...] * slf)
                sl = slf.astype(cdt)
            xs_ref[t * Cin_k:(t + 1) * Cin_k, :] = sl

    # Single deep matmul: (Cout_k, K*K*Cin_k) @ (K*K*Cin_k, L) -> f32.
    acc = jnp.dot(w_ref[...], xs_ref[...], preferred_element_type=jnp.float32)
    acc = acc + b_ref[...]
    if has_post:
        acc = jnp.where(acc >= 0.0, acc, post_ref[...] * acc)
    acc = acc * m_ref[...]                                  # zero garbage cols
    if has_res:
        acc = acc + res_ref[0, :, res_off:res_off + L].astype(jnp.float32)

    if emit_padded:
        o_ref[0] = jnp.zeros((Cout_k, Lout), o_ref.dtype)
        o_ref[0, :, off_out:off_out + L] = acc.astype(o_ref.dtype)
    else:
        o_ref[0] = acc.astype(o_ref.dtype)


def _mm_bias_kernel(x_ref, w_ref, b_ref, o_ref):
    """Tiled (rows, Cin) @ (Cin, Cout) + bias for 1x1 channel projections."""
    o_ref[...] = (jnp.dot(x_ref[...], w_ref[...],
                          preferred_element_type=jnp.float32) + b_ref[...])


_G1 = (0.25, 0.5, 0.25)


def _splat_weight_kernel(f_ref, err_ref, alphas_ref, o_ref, *, Wp, L):
    """3x3 Gaussian local flow variance + splat-weight formula (lane dense)."""
    sq = jnp.zeros((2, L), jnp.float32)
    mn = jnp.zeros((2, L), jnp.float32)
    for ky in range(3):
        for kx in range(3):
            g = _G1[ky] * _G1[kx]
            s = ky * Wp + kx
            sl = f_ref[0, :, s:s + L]                        # (2, L)
            sq = sq + g * (sl * sl)
            mn = mn + g * sl
    var = jnp.sqrt(jnp.maximum(sq - mn * mn, 1e-9))
    var = 0.5 * (var[0:1, :] + var[1:2, :])                  # mean over 2 chans
    err = err_ref[0]                                         # (1, L)
    a_fe = alphas_ref[0, 0]
    a_v = alphas_ref[0, 1]
    o_ref[0] = 1.0 / (1.0 + err * a_fe) + 1.0 / (1.0 + var * a_v)


# ---------------------------------------------------------------------------
# Pallas wrappers
# ---------------------------------------------------------------------------
def to_padded_flat(x, K, dtype=jnp.bfloat16):
    """NCHW -> zero-padded flattened bf16 layout (B, Ck, Hp*Wp + K - 1)."""
    B, C, H, W = x.shape
    pad = (K - 1) // 2
    Ck = _rup(C, 8)
    xp = jnp.pad(x.astype(dtype),
                 ((0, 0), (0, Ck - C), (pad, pad), (pad, pad)))
    xf = xp.reshape(B, Ck, (H + 2 * pad) * (W + 2 * pad))
    return jnp.pad(xf, ((0, 0), (0, 0), (0, K - 1)))


def from_padded_flat(xf, C, H, W, K, dtype=jnp.bfloat16):
    """Padded-flat -> valid NCHW."""
    B = xf.shape[0]
    pad = (K - 1) // 2
    Hp, Wp = H + 2 * pad, W + 2 * pad
    x = xf[:, :C, :Hp * Wp].reshape(B, C, Hp, Wp)
    return x[:, :, pad:pad + H, pad:pad + W].astype(dtype)


def conv_flat(xf, H, W, w, b, *, pre_alpha=None, post_alpha=None,
              residual=None, emit_padded=False, out_dtype=None):
    """Stride-1 'same' conv on a padded-flat input with fused epilogues."""
    B, Cxf, Lin = xf.shape
    Cout, Cin, K, _ = w.shape
    pad = (K - 1) // 2
    Hp, Wp = H + 2 * pad, W + 2 * pad
    L = H * Wp
    Cin_k = _rup(Cin, 8)
    Cout_k = _rup(Cout, 8)
    assert Cxf == Cin_k and Lin == Hp * Wp + K - 1

    # Tap-major weights: (Cout_k, K*K*Cin_k), cin fastest; matches stacked RHS.
    wt = jnp.transpose(w.astype(jnp.float32), (0, 2, 3, 1))      # (Cout,K,K,Cin)
    wt = jnp.pad(wt, ((0, Cout_k - Cout), (0, 0), (0, 0), (0, Cin_k - Cin)))
    w2 = wt.reshape(Cout_k, K * K * Cin_k).astype(jnp.bfloat16)
    bias = jnp.pad(b.astype(jnp.float32), (0, Cout_k - Cout)).reshape(Cout_k, 1)
    mask = ((jnp.arange(L, dtype=jnp.int32) % Wp) < W).astype(
        jnp.float32).reshape(1, L)

    inputs = [xf, w2, bias, mask]
    in_specs = [
        pl.BlockSpec((1, Cin_k, Lin), lambda bb: (bb, 0, 0)),
        pl.BlockSpec((Cout_k, K * K * Cin_k), lambda bb: (0, 0)),
        pl.BlockSpec((Cout_k, 1), lambda bb: (0, 0)),
        pl.BlockSpec((1, L), lambda bb: (0, 0)),
    ]
    if pre_alpha is not None:
        a = jnp.broadcast_to(jnp.asarray(pre_alpha, jnp.float32).reshape(-1),
                             (Cin,))
        a = jnp.pad(a, (0, Cin_k - Cin)).reshape(Cin_k, 1)
        inputs.append(a)
        in_specs.append(pl.BlockSpec((Cin_k, 1), lambda bb: (0, 0)))
    if post_alpha is not None:
        a = jnp.broadcast_to(jnp.asarray(post_alpha, jnp.float32).reshape(-1),
                             (Cout,))
        a = jnp.pad(a, (0, Cout_k - Cout)).reshape(Cout_k, 1)
        inputs.append(a)
        in_specs.append(pl.BlockSpec((Cout_k, 1), lambda bb: (0, 0)))
    res_off = 0
    if residual is not None:
        assert residual.shape == (B, Cout_k, Lin)
        res_off = pad * (Wp + 1)
        inputs.append(residual)
        in_specs.append(pl.BlockSpec((1, Cout_k, Lin), lambda bb: (bb, 0, 0)))

    if emit_padded:
        Lout = Hp * Wp + K - 1
        off_out = pad * (Wp + 1)
        odt = jnp.bfloat16 if out_dtype is None else out_dtype
    else:
        Lout = L
        off_out = 0
        odt = jnp.float32 if out_dtype is None else out_dtype
    out_shape = jax.ShapeDtypeStruct((B, Cout_k, Lout), odt)
    out_spec = pl.BlockSpec((1, Cout_k, Lout), lambda bb: (bb, 0, 0))

    odt_bytes = jnp.dtype(odt).itemsize
    est = (2 * Cin_k * Lin * 2 + 2 * Cout_k * Lout * odt_bytes
           + K * K * Cin_k * L * 2 + Cout_k * K * K * Cin_k * 2
           + (2 * Cout_k * Lin * 2 if residual is not None else 0))

    kernel = functools.partial(
        _conv_fold_kernel, K=K, Wp=Wp, L=L, Cin_k=Cin_k, Cout_k=Cout_k,
        Lout=Lout, off_out=off_out, res_off=res_off,
        has_pre=pre_alpha is not None, has_post=post_alpha is not None,
        has_res=residual is not None, emit_padded=emit_padded)
    out = pl.pallas_call(
        kernel,
        grid=(B,),
        in_specs=in_specs,
        out_specs=out_spec,
        out_shape=out_shape,
        scratch_shapes=[pltpu.VMEM((K * K * Cin_k, L), xf.dtype)],
        compiler_params=_mosaic_params(est),
    )(*inputs)
    if emit_padded:
        return out
    return out[:, :Cout].reshape(B, Cout, H, Wp)[:, :, :, :W]


def conv2d(x, w, b, *, padding=0, pad_mode="zeros",
           pre_alpha=None, post_alpha=None):
    """Single stride-1 'same' NCHW conv (zero or reflect padding)."""
    Cout, Cin, K, _ = w.shape
    if K == 1:
        assert padding == 0
        return conv1x1(x, w, b)
    B, _, H, W = x.shape
    assert 2 * padding == K - 1
    if pad_mode == "reflect":
        Ck = _rup(Cin, 8)
        xr = jnp.pad(x.astype(jnp.bfloat16),
                     ((0, 0), (0, 0), (padding, padding), (padding, padding)),
                     mode="reflect")
        xr = jnp.pad(xr, ((0, 0), (0, Ck - Cin), (0, 0), (0, 0)))
        xf = xr.reshape(B, Ck, (H + 2 * padding) * (W + 2 * padding))
        xf = jnp.pad(xf, ((0, 0), (0, 0), (0, K - 1)))
    else:
        xf = to_padded_flat(x, K)
    return conv_flat(xf, H, W, w, b, pre_alpha=pre_alpha,
                     post_alpha=post_alpha, emit_padded=False)


def conv1x1(x, w, b):
    """1x1 conv as one tiled lane-dense matmul over B*H*W rows."""
    B, Cin, H, W = x.shape
    Cout = w.shape[0]
    M = B * H * W
    xr = jnp.transpose(x.astype(jnp.bfloat16), (0, 2, 3, 1)).reshape(M, Cin)
    TM = 256 if M >= 256 else _rup(M, 8)
    Mp = _rup(M, TM)
    if Mp != M:
        xr = jnp.pad(xr, ((0, Mp - M), (0, 0)))
    wr = jnp.transpose(w.reshape(Cout, Cin)).astype(jnp.bfloat16)
    br = b.astype(jnp.float32).reshape(1, Cout)
    est = 2 * (TM * Cin * 2 + TM * Cout * 4) + Cin * Cout * 2
    out = pl.pallas_call(
        _mm_bias_kernel,
        grid=(Mp // TM,),
        in_specs=[pl.BlockSpec((TM, Cin), lambda i: (i, 0)),
                  pl.BlockSpec((Cin, Cout), lambda i: (0, 0)),
                  pl.BlockSpec((1, Cout), lambda i: (0, 0))],
        out_specs=pl.BlockSpec((TM, Cout), lambda i: (i, 0)),
        out_shape=jax.ShapeDtypeStruct((Mp, Cout), jnp.float32),
        compiler_params=_mosaic_params(est),
    )(xr, wr, br)
    out = out[:M].reshape(B, H, W, Cout)
    return jnp.transpose(out, (0, 3, 1, 2))


def splat_weights_pallas(flow, err, alpha_fe, alpha_v):
    """flow: (N, 2, H, W); err: (N, 1, H, W) -> (N, 1, H, W) splat weights."""
    N, _, H, W = flow.shape
    Hp, Wp = H + 2, W + 2
    L = H * Wp
    Lin = Hp * Wp + 2
    fpad = jnp.pad(flow.astype(jnp.float32),
                   ((0, 0), (0, 0), (1, 1), (1, 1)), mode="reflect")
    ff = jnp.pad(fpad.reshape(N, 2, Hp * Wp), ((0, 0), (0, 0), (0, 2)))
    errf = jnp.pad(err.astype(jnp.float32),
                   ((0, 0), (0, 0), (0, 0), (0, Wp - W))).reshape(N, 1, L)
    alphas = jnp.concatenate(
        [alpha_fe.reshape(-1), alpha_v.reshape(-1)]).astype(
            jnp.float32).reshape(1, 2)
    est = 2 * (2 * Lin * 4 + 2 * L * 4)
    kernel = functools.partial(_splat_weight_kernel, Wp=Wp, L=L)
    out = pl.pallas_call(
        kernel,
        grid=(N,),
        in_specs=[
            pl.BlockSpec((1, 2, Lin), lambda n: (n, 0, 0)),
            pl.BlockSpec((1, 1, L), lambda n: (n, 0, 0)),
            pl.BlockSpec((1, 2), lambda n: (0, 0),
                         memory_space=pltpu.MemorySpace.SMEM),
        ],
        out_specs=pl.BlockSpec((1, 1, L), lambda n: (n, 0, 0)),
        out_shape=jax.ShapeDtypeStruct((N, 1, L), jnp.float32),
        compiler_params=_mosaic_params(est),
    )(ff, errf, alphas)
    return out.reshape(N, 1, H, Wp)[:, :, :, :W]


# ---------------------------------------------------------------------------
# Plain-JAX glue (gather / scatter ops with no clean Pallas TPU equivalent)
# ---------------------------------------------------------------------------
def backward_warp(x, flow):
    # TODO(synk): bilinear gather (grid_sample-like) kept in plain JAX (batched
    # advanced indexing, no vmap); border handling uses zero padding.
    B, C, H, W = x.shape
    gy, gx = jnp.meshgrid(jnp.arange(H, dtype=jnp.float32),
                          jnp.arange(W, dtype=jnp.float32), indexing="ij")
    sx = gx[None] + flow[:, 0]
    sy = gy[None] + flow[:, 1]
    x0 = jnp.floor(sx)
    y0 = jnp.floor(sy)
    x1, y1 = x0 + 1.0, y0 + 1.0
    wx1, wy1 = sx - x0, sy - y0
    wx0, wy0 = 1.0 - wx1, 1.0 - wy1
    flat = x.reshape(B, C, H * W)
    b_ix = jnp.arange(B)[:, None]

    def gather(xi, yi):
        valid = ((xi >= 0) & (xi <= W - 1) & (yi >= 0) & (yi <= H - 1))
        lin = (jnp.clip(yi, 0, H - 1).astype(jnp.int32) * W
               + jnp.clip(xi, 0, W - 1).astype(jnp.int32)).reshape(B, H * W)
        vals = flat[b_ix, :, lin]                        # (B, H*W, C)
        vals = jnp.transpose(vals, (0, 2, 1)).reshape(B, C, H, W)
        return vals * valid[:, None].astype(x.dtype)

    return (gather(x0, y0) * (wy0 * wx0)[:, None]
            + gather(x1, y0) * (wy0 * wx1)[:, None]
            + gather(x0, y1) * (wy1 * wx0)[:, None]
            + gather(x1, y1) * (wy1 * wx1)[:, None])


def softsplat(tenIn, tenFlow, tenMetric, strMode="soft-zeroeps"):
    # TODO(synk): forward bilinear splatting is a scatter-add; kept in plain
    # JAX ("soft" + zero-eps normalization) but merged into ONE batched scatter.
    B, C, H, W = tenIn.shape
    assert strMode.startswith("soft")
    vals = jnp.concatenate([tenIn * jnp.exp(tenMetric), jnp.exp(tenMetric)],
                           axis=1)
    Cp = C + 1
    gy, gx = jnp.meshgrid(jnp.arange(H, dtype=jnp.float32),
                          jnp.arange(W, dtype=jnp.float32), indexing="ij")
    tx = gx[None] + tenFlow[:, 0]
    ty = gy[None] + tenFlow[:, 1]
    x0 = jnp.floor(tx)
    y0 = jnp.floor(ty)
    fx, fy = tx - x0, ty - y0
    corners = [(x0, y0, (1 - fx) * (1 - fy)), (x0 + 1, y0, fx * (1 - fy)),
               (x0, y0 + 1, (1 - fx) * fy), (x0 + 1, y0 + 1, fx * fy)]
    flat_t = jnp.transpose(vals.reshape(B, Cp, H * W), (0, 2, 1))   # (B,HW,Cp)
    lin_list, val_list = [], []
    for xi, yi, w in corners:
        valid = ((xi >= 0) & (xi <= W - 1) & (yi >= 0) & (yi <= H - 1))
        wv = (w * valid.astype(jnp.float32)).reshape(B, H * W)
        lin = (jnp.clip(yi, 0, H - 1).astype(jnp.int32) * W
               + jnp.clip(xi, 0, W - 1).astype(jnp.int32)).reshape(B, H * W)
        lin_list.append(lin)
        val_list.append(flat_t * wv[..., None])
    lin_all = jnp.concatenate(lin_list, axis=1)                      # (B,4HW)
    val_all = jnp.concatenate(val_list, axis=1)                      # (B,4HW,Cp)
    b_ix = jnp.arange(B)[:, None]
    out = jnp.zeros((B, H * W, Cp), jnp.float32).at[b_ix, lin_all].add(val_all)
    out = jnp.transpose(out, (0, 2, 1)).reshape(B, Cp, H, W)
    num, den = out[:, :C], out[:, C:]
    return jnp.where(den != 0.0, num / jnp.where(den != 0.0, den, 1.0), 0.0)


def normalize_flow(flows):
    # TODO(synk): normalize_flow not defined in the snippet; assumed
    # per-sample max-abs normalization with returned scalers.
    scaler = jnp.max(jnp.abs(flows), axis=(1, 2, 3, 4), keepdims=True) + 1e-6
    return flows / scaler, scaler


# ---------------------------------------------------------------------------
# Model
# ---------------------------------------------------------------------------
class GIMMVFI_R_Pallas:
    """Pallas implementation of the compute defined inside GIMMVFI_R."""

    def __init__(self, seed=0):
        key = jax.random.PRNGKey(seed)
        cnt = [0]

        def rnd(shape, scale=0.05):
            cnt[0] += 1
            return scale * jax.random.normal(
                jax.random.fold_in(key, cnt[0]), shape, jnp.float32)

        def zeros(n):
            return jnp.zeros((n,), jnp.float32)

        def lb(c):
            # TODO(synk): LateralBlock definition not in the snippet; assumed
            # residual PReLU -> Conv3x3 -> PReLU -> Conv3x3 structure.
            return dict(a1=jnp.full((1,), 0.25, jnp.float32),
                        w1=rnd((c, c, 3, 3)), b1=zeros(c),
                        a2=jnp.full((1,), 0.25, jnp.float32),
                        w2=rnd((c, c, 3, 3)), b2=zeros(c))

        p = {}
        p["last_cproj_w"], p["last_cproj_b"] = rnd((256, 128, 1, 1)), zeros(256)
        p["second_last_cproj_w"], p["second_last_cproj_b"] = rnd((128, 96, 1, 1)), zeros(128)
        p["fproj_w"], p["fproj_b"] = rnd((256, 256, 1, 1)), zeros(256)
        p["comb1_w"], p["comb1_b"] = rnd((18, 9, 7, 7)), zeros(18)
        p["comb1_a"] = jnp.full((18,), 0.25, jnp.float32)
        p["comb2_w"], p["comb2_b"] = rnd((3, 18, 7, 7)), zeros(3)
        p["alpha_v"] = jnp.ones((1,), jnp.float32)
        p["alpha_fe"] = jnp.ones((1,), jnp.float32)
        p["enc0_w"], p["enc0_b"] = rnd((16, 2, 3, 3)), zeros(16)
        p["enc1_w"], p["enc1_b"] = rnd((32, 16, 3, 3)), zeros(32)
        p["enc_lb"] = [lb(32) for _ in range(3)]
        p["enc2_w"], p["enc2_b"] = rnd((16, 32, 3, 3)), zeros(16)
        p["res0_w"], p["res0_b"] = rnd((32, 64, 3, 3)), zeros(32)
        p["res1_w"], p["res1_b"] = rnd((64, 32, 3, 3)), zeros(64)
        p["res_lb"] = [lb(64)]
        p["res2_w"], p["res2_b"] = rnd((32, 64, 3, 3)), zeros(32)
        self.p = p
        self.num_flows = 3
        self.fwarp_type = "soft"

    # -- building blocks ----------------------------------------------------
    def _lateral_block_flat(self, hf, q, H, W):
        # prelu -> conv -> prelu -> conv -> +x, all fused; stays padded-flat.
        h1 = conv_flat(hf, H, W, q["w1"], q["b1"],
                       pre_alpha=q["a1"], post_alpha=q["a2"], emit_padded=True)
        return conv_flat(h1, H, W, q["w2"], q["b2"], residual=hf,
                         emit_padded=True)

    def cnn_encoder(self, x):
        p = self.p
        B, _, H, W = x.shape
        hf = to_padded_flat(x, 3)
        hf = conv_flat(hf, H, W, p["enc0_w"], p["enc0_b"], emit_padded=True)
        hf = conv_flat(hf, H, W, p["enc1_w"], p["enc1_b"], post_alpha=0.1,
                       emit_padded=True)
        for q in p["enc_lb"]:
            hf = self._lateral_block_flat(hf, q, H, W)
        h = from_padded_flat(hf, 32, H, W, 3)
        # trailing LeakyReLU(0.1) fused as pre-activation of the reflect conv
        # (pointwise activation commutes with reflection padding).
        return conv2d(h, p["enc2_w"], p["enc2_b"], padding=1,
                      pad_mode="reflect", pre_alpha=0.1)

    def res_conv(self, x):
        p = self.p
        B, _, H, W = x.shape
        hf = to_padded_flat(x, 3)
        hf = conv_flat(hf, H, W, p["res0_w"], p["res0_b"], emit_padded=True)
        hf = conv_flat(hf, H, W, p["res1_w"], p["res1_b"], post_alpha=0.1,
                       emit_padded=True)
        for q in p["res_lb"]:
            hf = self._lateral_block_flat(hf, q, H, W)
        h = from_padded_flat(hf, 64, H, W, 3)
        return conv2d(h, p["res2_w"], p["res2_b"], padding=1,
                      pad_mode="reflect", pre_alpha=0.1)

    def comb_block(self, x):
        p = self.p
        B, _, H, W = x.shape
        hf = to_padded_flat(x, 7)
        hf = conv_flat(hf, H, W, p["comb1_w"], p["comb1_b"],
                       post_alpha=p["comb1_a"], emit_padded=True)
        return conv_flat(hf, H, W, p["comb2_w"], p["comb2_b"],
                         emit_padded=False)

    # -- pieces of the reference forward -------------------------------------
    def cal_splatting_weights(self, raft_flow01, raft_flow10):
        B = raft_flow01.shape[0]
        flows = jnp.concatenate([raft_flow01, raft_flow10], axis=0)
        f01_warp = -backward_warp(raft_flow10, raft_flow01)
        f10_warp = -backward_warp(raft_flow01, raft_flow10)
        err01 = jnp.abs(f01_warp - raft_flow01).mean(axis=1, keepdims=True)
        err02 = jnp.abs(f10_warp - raft_flow10).mean(axis=1, keepdims=True)
        errs = jnp.concatenate([err01, err02], axis=0)
        w = splat_weights_pallas(flows, errs, self.p["alpha_fe"],
                                 self.p["alpha_v"])
        return w[:B], w[B:]

    def forward(self, img_xs, coord=None, t=None, flows=None,
                features0=None, features1=None, fnet0=None, fnet1=None):
        # TODO(synk): RAFT flow_estimator, BidirCorrBlock, HypoNet and the AMT
        # init/final decoders + BasicUpdateBlocks are external modules not
        # defined in the reference snippet; flows / pyramid features are taken
        # as inputs and those stages are omitted here.
        del img_xs, coord
        p = self.p
        f01 = flows[:, :, 0]
        f10 = flows[:, :, 1]
        B = f01.shape[0]

        # fused 1x1 projections (shared weights -> one pallas_call per weight).
        proj = conv1x1(jnp.concatenate([fnet0, fnet1], axis=0),
                       p["fproj_w"], p["fproj_b"])
        proj_fnet0, proj_fnet1 = proj[:B], proj[B:]
        fsl = conv1x1(jnp.concatenate([features0[0], features1[0]], axis=0),
                      p["second_last_cproj_w"], p["second_last_cproj_b"])
        fl = conv1x1(jnp.concatenate([features0[1], features1[1]], axis=0),
                     p["last_cproj_w"], p["last_cproj_b"])
        feats0 = [fsl[:B], fl[:B]]
        feats1 = [fsl[B:], fl[B:]]

        normal_flows, flow_scalers = normalize_flow(
            jnp.stack([f01, -f10], axis=2))

        # predict_flow pixel-latent path.
        weights1, weights2 = self.cal_splatting_weights(f01, f10)
        pixel_latent_0 = self.cnn_encoder(normal_flows[:, :, 0])
        pixel_latent_1 = self.cnn_encoder(normal_flows[:, :, 1])
        pixel_latent = []
        for cur_t in t:
            cur_t = cur_t.reshape(-1, 1, 1, 1)
            tmp0 = softsplat(pixel_latent_0, f01 * cur_t, weights1,
                             strMode=self.fwarp_type + "-zeroeps")
            tmp1 = softsplat(pixel_latent_1, f10 * (1.0 - cur_t), weights2,
                             strMode=self.fwarp_type + "-zeroeps")
            tmp = jnp.concatenate([tmp0, tmp1], axis=1)
            tmp = tmp + self.res_conv(
                jnp.concatenate([pixel_latent_0, pixel_latent_1, tmp], axis=1))
            pixel_latent.append(jnp.transpose(tmp, (0, 2, 3, 1)))
        # TODO(synk): HypoNet evaluation and frame_synthesize omitted
        # (module definitions not available in the snippet).

        return {
            "nflow": normal_flows,
            "flow_scalers": flow_scalers,
            "raft_flow": jnp.stack([f01, f10], axis=2),
            "weights": (weights1, weights2),
            "pixel_latent": pixel_latent,
            "features0": feats0,
            "features1": feats1,
            "corr_feat": (proj_fnet0, proj_fnet1),
        }


# ---------------------------------------------------------------------------
if __name__ == "__main__":
    key = jax.random.PRNGKey(0)
    B, H, W = 2, 16, 16
    ks = jax.random.split(key, 14)

    img_xs = jax.random.uniform(ks[0], (B, 3, 2, H, W), jnp.float32)
    f01 = 2.0 * jax.random.normal(ks[1], (B, 2, H, W), jnp.float32)
    f10 = 2.0 * jax.random.normal(ks[2], (B, 2, H, W), jnp.float32)
    flows = jnp.stack([f01, f10], axis=2)                       # (B, 2, 2, H, W)
    features0 = [jax.random.normal(ks[3], (B, 96, 8, 8), jnp.float32),
                 jax.random.normal(ks[4], (B, 128, 4, 4), jnp.float32)]
    features1 = [jax.random.normal(ks[5], (B, 96, 8, 8), jnp.float32),
                 jax.random.normal(ks[6], (B, 128, 4, 4), jnp.float32)]
    fnet0 = jax.random.normal(ks[7], (B, 256, 4, 4), jnp.float32)
    fnet1 = jax.random.normal(ks[8], (B, 256, 4, 4), jnp.float32)
    t = [jnp.full((B,), 0.5, jnp.float32)]

    # sanity check 1: tap-folded fused conv kernel vs XLA conv (bf16 tol).
    xc = jax.random.normal(ks[10], (B, 16, H, W), jnp.float32)
    wc = 0.05 * jax.random.normal(ks[11], (32, 16, 3, 3), jnp.float32)
    bc = jnp.linspace(-0.1, 0.1, 32, dtype=jnp.float32)
    got = conv2d(xc, wc, bc, padding=1)
    ref = jax.lax.conv_general_dilated(
        xc, wc, window_strides=(1, 1), padding="SAME",
        dimension_numbers=("NCHW", "OIHW", "NCHW")) + bc.reshape(1, -1, 1, 1)
    assert jnp.allclose(got, ref, atol=5e-2, rtol=5e-2), float(
        jnp.max(jnp.abs(got - ref)))

    # sanity check 2: chained padded-flat emission (two convs) vs XLA.
    wc2 = 0.05 * jax.random.normal(ks[12], (16, 32, 3, 3), jnp.float32)
    bc2 = jnp.zeros((16,), jnp.float32)
    hf = to_padded_flat(xc, 3)
    hf = conv_flat(hf, H, W, wc, bc, emit_padded=True)
    got2 = conv_flat(hf, H, W, wc2, bc2, emit_padded=False)
    ref1 = ref.astype(jnp.bfloat16).astype(jnp.float32)
    ref2 = jax.lax.conv_general_dilated(
        ref1, wc2, window_strides=(1, 1), padding="SAME",
        dimension_numbers=("NCHW", "OIHW", "NCHW")) + bc2.reshape(1, -1, 1, 1)
    assert jnp.allclose(got2, ref2, atol=5e-2, rtol=5e-2), float(
        jnp.max(jnp.abs(got2 - ref2)))

    model = GIMMVFI_R_Pallas(seed=0)
    out = model.forward(img_xs, coord=None, t=t, flows=flows,
                        features0=features0, features1=features1,
                        fnet0=fnet0, fnet1=fnet1)
    jax.block_until_ready(out)

    # exercise amt_comb_block (7x7 conv -> PReLU -> 7x7 conv) on a 9-ch stack.
    comb_in = jax.random.normal(ks[9], (B, 3 * model.num_flows, H, W),
                                jnp.float32)
    comb_out = model.comb_block(comb_in)
    jax.block_until_ready(comb_out)
    assert comb_out.shape == (B, 3, H, W)
    assert out["pixel_latent"][0].shape == (B, H, W, 32)
    assert out["weights"][0].shape == (B, 1, H, W)
    assert out["corr_feat"][0].shape == (B, 256, 4, 4)

    print("KERNEL_OK")
</pallas_src>

<mosaic_0001>
module attributes {stable_mosaic.version = 11 : i64} {
  func.func @_conv_fold_kernel(%arg0: i32, %arg1: memref<1x16x326xbf16, #tpu.memory_space<vmem>>, %arg2: memref<32x144xbf16, #tpu.memory_space<vmem>>, %arg3: memref<32x1xf32, #tpu.memory_space<vmem>>, %arg4: memref<1x288xf32, #tpu.memory_space<vmem>>, %arg5: memref<1x32x288xf32, #tpu.memory_space<vmem>>, %arg6: memref<144x288xbf16, #tpu.memory_space<vmem>>) attributes {dimension_semantics = [#tpu.dimension_semantics<parallel>], iteration_bounds = array<i64: 2>, scalar_prefetch = 0 : i64, scratch_operands = 1 : i64, tpu.core_type = #tpu.core_type<tc>, window_params = [{transform_indices = @transform_0, window_bounds = array<i64: 1, 16, 326>}, {pipeline_mode = #tpu.pipeline_mode<synchronous>, transform_indices = @transform_1, window_bounds = array<i64: 32, 144>}, {pipeline_mode = #tpu.pipeline_mode<synchronous>, transform_indices = @transform_2, window_bounds = array<i64: 32, 1>}, {pipeline_mode = #tpu.pipeline_mode<synchronous>, transform_indices = @transform_3, window_bounds = array<i64: 1, 288>}, {transform_indices = @transform_4, window_bounds = array<i64: 1, 32, 288>}]} {
    %c0 = arith.constant 0 : index
    %c0_0 = arith.constant 0 : index
    %c0_1 = arith.constant 0 : index
    %0 = vector.load %arg1[%c0, %c0_0, %c0_1] : memref<1x16x326xbf16, #tpu.memory_space<vmem>>, vector<1x16x288xbf16>
    %1 = vector.shape_cast %0 : vector<1x16x288xbf16> to vector<16x288xbf16>
    %c0_2 = arith.constant 0 : index
    %c0_3 = arith.constant 0 : index
    %2 = vector.load %arg6[%c0_2, %c0_3] : memref<144x288xbf16, #tpu.memory_space<vmem>>, vector<16x288xbf16>
    tpu.vector_store %arg6[%c0_2, %c0_3], %1 {strides = array<i32>} : memref<144x288xbf16, #tpu.memory_space<vmem>>, vector<16x288xbf16>,
    %c0_4 = arith.constant 0 : index
    %c0_5 = arith.constant 0 : index
    %c1 = arith.constant 1 : index
    %3 = vector.load %arg1[%c0_4, %c0_5, %c1] : memref<1x16x326xbf16, #tpu.memory_space<vmem>>, vector<1x16x288xbf16>
    %4 = vector.shape_cast %3 : vector<1x16x288xbf16> to vector<16x288xbf16>
    %c16 = arith.constant 16 : index
    %c0_6 = arith.constant 0 : index
    %5 = vector.load %arg6[%c16, %c0_6] : memref<144x288xbf16, #tpu.memory_space<vmem>>, vector<16x288xbf16>
    tpu.vector_store %arg6[%c16, %c0_6], %4 {strides = array<i32>} : memref<144x288xbf16, #tpu.memory_space<vmem>>, vector<16x288xbf16>,
    %c0_7 = arith.constant 0 : index
    %c0_8 = arith.constant 0 : index
    %c2 = arith.constant 2 : index
    %6 = vector.load %arg1[%c0_7, %c0_8, %c2] : memref<1x16x326xbf16, #tpu.memory_space<vmem>>, vector<1x16x288xbf16>
    %7 = vector.shape_cast %6 : vector<1x16x288xbf16> to vector<16x288xbf16>
    %c32 = arith.constant 32 : index
    %c0_9 = arith.constant 0 : index
    %8 = vector.load %arg6[%c32, %c0_9] : memref<144x288xbf16, #tpu.memory_space<vmem>>, vector<16x288xbf16>
    tpu.vector_store %arg6[%c32, %c0_9], %7 {strides = array<i32>} : memref<144x288xbf16, #tpu.memory_space<vmem>>, vector<16x288xbf16>,
    %c0_10 = arith.constant 0 : index
    %c0_11 = arith.constant 0 : index
    %c18 = arith.constant 18 : index
    %9 = vector.load %arg1[%c0_10, %c0_11, %c18] : memref<1x16x326xbf16, #tpu.memory_space<vmem>>, vector<1x16x288xbf16>
    %10 = vector.shape_cast %9 : vector<1x16x288xbf16> to vector<16x288xbf16>
    %c48 = arith.constant 48 : index
    %c0_12 = arith.constant 0 : index
    %11 = vector.load %arg6[%c48, %c0_12] : memref<144x288xbf16, #tpu.memory_space<vmem>>, vector<16x288xbf16>
    tpu.vector_store %arg6[%c48, %c0_12], %10 {strides = array<i32>} : memref<144x288xbf16, #tpu.memory_space<vmem>>, vector<16x288xbf16>,
    %c0_13 = arith.constant 0 : index
    %c0_14 = arith.constant 0 : index
    %c19 = arith.constant 19 : index
    %12 = vector.load %arg1[%c0_13, %c0_14, %c19] : memref<1x16x326xbf16, #tpu.memory_space<vmem>>, vector<1x16x288xbf16>
    %13 = vector.shape_cast %12 : vector<1x16x288xbf16> to vector<16x288xbf16>
    %c64 = arith.constant 64 : index
    %c0_15 = arith.constant 0 : index
    %14 = vector.load %arg6[%c64, %c0_15] : memref<144x288xbf16, #tpu.memory_space<vmem>>, vector<16x288xbf16>
    tpu.vector_store %arg6[%c64, %c0_15], %13 {strides = array<i32>} : memref<144x288xbf16, #tpu.memory_space<vmem>>, vector<16x288xbf16>,
    %c0_16 = arith.constant 0 : index
    %c0_17 = arith.constant 0 : index
    %c20 = arith.constant 20 : index
    %15 = vector.load %arg1[%c0_16, %c0_17, %c20] : memref<1x16x326xbf16, #tpu.memory_space<vmem>>, vector<1x16x288xbf16>
    %16 = vector.shape_cast %15 : vector<1x16x288xbf16> to vector<16x288xbf16>
    %c80 = arith.constant 80 : index
    %c0_18 = arith.constant 0 : index
    %17 = vector.load %arg6[%c80, %c0_18] : memref<144x288xbf16, #tpu.memory_space<vmem>>, vector<16x288xbf16>
    tpu.vector_store %arg6[%c80, %c0_18], %16 {strides = array<i32>} : memref<144x288xbf16, #tpu.memory_space<vmem>>, vector<16x288xbf16>,
    %c0_19 = arith.constant 0 : index
    %c0_20 = arith.constant 0 : index
    %c36 = arith.constant 36 : index
    %18 = vector.load %arg1[%c0_19, %c0_20, %c36] : memref<1x16x326xbf16, #tpu.memory_space<vmem>>, vector<1x16x288xbf16>
    %19 = vector.shape_cast %18 : vector<1x16x288xbf16> to vector<16x288xbf16>
    %c96 = arith.constant 96 : index
    %c0_21 = arith.constant 0 : index
    %20 = vector.load %arg6[%c96, %c0_21] : memref<144x288xbf16, #tpu.memory_space<vmem>>, vector<16x288xbf16>
    tpu.vector_store %arg6[%c96, %c0_21], %19 {strides = array<i32>} : memref<144x288xbf16, #tpu.memory_space<vmem>>, vector<16x288xbf16>,
    %c0_22 = arith.constant 0 : index
    %c0_23 = arith.constant 0 : index
    %c37 = arith.constant 37 : index
    %21 = vector.load %arg1[%c0_22, %c0_23, %c37] : memref<1x16x326xbf16, #tpu.memory_space<vmem>>, vector<1x16x288xbf16>
    %22 = vector.shape_cast %21 : vector<1x16x288xbf16> to vector<16x288xbf16>
    %c112 = arith.constant 112 : index
    %c0_24 = arith.constant 0 : index
    %23 = vector.load %arg6[%c112, %c0_24] : memref<144x288xbf16, #tpu.memory_space<vmem>>, vector<16x288xbf16>
    tpu.vector_store %arg6[%c112, %c0_24], %22 {strides = array<i32>} : memref<144x288xbf16, #tpu.memory_space<vmem>>, vector<16x288xbf16>,
    %c0_25 = arith.constant 0 : index
    %c0_26 = arith.constant 0 : index
    %c38 = arith.constant 38 : index
    %24 = vector.load %arg1[%c0_25, %c0_26, %c38] : memref<1x16x326xbf16, #tpu.memory_space<vmem>>, vector<1x16x288xbf16>
    %25 = vector.shape_cast %24 : vector<1x16x288xbf16> to vector<16x288xbf16>
    %c128 = arith.constant 128 : index
    %c0_27 = arith.constant 0 : index
    %26 = vector.load %arg6[%c128, %c0_27] : memref<144x288xbf16, #tpu.memory_space<vmem>>, vector<16x288xbf16>
    tpu.vector_store %arg6[%c128, %c0_27], %25 {strides = array<i32>} : memref<144x288xbf16, #tpu.memory_space<vmem>>, vector<16x288xbf16>,
    %c0_28 = arith.constant 0 : index
    %c0_29 = arith.constant 0 : index
    %27 = vector.load %arg2[%c0_28, %c0_29] : memref<32x144xbf16, #tpu.memory_space<vmem>>, vector<32x144xbf16>
    %c0_30 = arith.constant 0 : index
    %c0_31 = arith.constant 0 : index
    %28 = vector.load %arg6[%c0_30, %c0_31] : memref<144x288xbf16, #tpu.memory_space<vmem>>, vector<144x288xbf16>
    %cst = arith.constant dense<0.000000e+00> : vector<32x288xf32>
    %29 = tpu.matmul %27, %28, %cst {dimension_numbers = #tpu.dot_dimension_numbers<[1], [0], [0], [1], [0, 0, 1, 1], [], []>} : vector<32x144xbf16>, vector<144x288xbf16>, vector<32x288xf32> -> vector<32x288xf32>
    %c0_32 = arith.constant 0 : index
    %c0_33 = arith.constant 0 : index
    %30 = vector.load %arg3[%c0_32, %c0_33] : memref<32x1xf32, #tpu.memory_space<vmem>>, vector<32x1xf32>
    %31 = vector.broadcast %30 : vector<32x1xf32> to vector<32x288xf32>
    %32 = arith.addf %29, %31 : vector<32x288xf32>
    %c0_34 = arith.constant 0 : index
    %c0_35 = arith.constant 0 : index
    %33 = vector.load %arg4[%c0_34, %c0_35] : memref<1x288xf32, #tpu.memory_space<vmem>>, vector<1x288xf32>
    %34 = vector.broadcast %33 : vector<1x288xf32> to vector<32x288xf32>
    %35 = arith.mulf %32, %34 : vector<32x288xf32>
    %c0_36 = arith.constant 0 : index
    %c0_37 = arith.constant 0 : index
    %c0_38 = arith.constant 0 : index
    %36 = vector.load %arg5[%c0_36, %c0_37, %c0_38] : memref<1x32x288xf32, #tpu.memory_space<vmem>>, vector<1x32x288xf32>
    %37 = vector.shape_cast %36 : vector<1x32x288xf32> to vector<32x288xf32>
    %38 = vector.shape_cast %35 : vector<32x288xf32> to vector<1x32x288xf32>
    tpu.vector_store %arg5[%c0_36, %c0_37, %c0_38], %38 {strides = array<i32>} : memref<1x32x288xf32, #tpu.memory_space<vmem>>, vector<1x32x288xf32>,
    return
  }
  func.func @transform_0(%arg0: i32) -> (i32, i32, i32) {
    %c0_i32 = arith.constant 0 : i32
    %c0_i32_0 = arith.constant 0 : i32
    %c0_i32_1 = arith.constant 0 : i32
    return %arg0, %c0_i32, %c0_i32_0 : i32, i32, i32
  }
  func.func @transform_1(%arg0: i32) -> (i32, i32) {
    %c0_i32 = arith.constant 0 : i32
    %c0_i32_0 = arith.constant 0 : i32
    %c0_i32_1 = arith.constant 0 : i32
    return %c0_i32, %c0_i32_0 : i32, i32
  }
  func.func @transform_2(%arg0: i32) -> (i32, i32) {
    %c0_i32 = arith.constant 0 : i32
    %c0_i32_0 = arith.constant 0 : i32
    %c0_i32_1 = arith.constant 0 : i32
    return %c0_i32, %c0_i32_0 : i32, i32
  }
  func.func @transform_3(%arg0: i32) -> (i32, i32) {
    %c0_i32 = arith.constant 0 : i32
    %c0_i32_0 = arith.constant 0 : i32
    %c0_i32_1 = arith.constant 0 : i32
    return %c0_i32, %c0_i32_0 : i32, i32
  }
  func.func @transform_4(%arg0: i32) -> (i32, i32, i32) {
    %c0_i32 = arith.constant 0 : i32
    %c0_i32_0 = arith.constant 0 : i32
    %c0_i32_1 = arith.constant 0 : i32
    return %arg0, %c0_i32, %c0_i32_0 : i32, i32, i32
  }
}

</mosaic_0001>

<bundles_post_ra>
// kernel: tpu_custom_call.1
= control target key start
LH: loop header
LB: loop body
LE: loop exit
PB: predicated region body
PF: predicated region fallthrough
CT: control target
= control target key end

     0   :  { %s1720_s0 = inlined_call_operand.hbm [shape: bf16[2,16,326], index: 0, kind: input, shape index: {}]   ;;  %s1721_s1 = inlined_call_operand.vmem [shape: bf16[32,144], index: 1, kind: input, shape index: {}]   ;;  %s1722_s2 = inlined_call_operand.vmem [shape: f32[32,1], index: 2, kind: input, shape index: {}]   ;;  %s1723_s3 = inlined_call_operand.hbm [shape: f32[1,288], index: 3, kind: input, shape index: {}]   ;;  %s1724_s4 = inlined_call_operand.hbm [shape: f32[2,32,288], index: 4, kind: output, shape index: {}]  }
   0x1   :  { %1725 = sst [smem:[#allocation12_spill]] %s1723_s3 }
   0x2   :  { %9 = vsyncpa [#allocation4], 0 }
   0x3   :  { %11 = vsyncpa [#allocation4 + $0x1], 0 }
   0x4   :  { %12 = vsyncpa [#allocation7], 0 }
   0x5   :  { %13 = vsyncpa [#allocation5], 0 }
   0x6   :  { %15 = vsyncpa [#allocation5 + $0x1], 0  ;;  %s1407_s15 = smov 0   ;;  %s1409_s16 = smov 0  }
   0x7   :  { %s1411_s17 = smov 0   ;;  %s1413_s18 = smov 0  }
   0x8 LB: > { %s1428_s19 = sadd.s32 4294967295, %s1366_s18   ;;  %s987_s20 = sadd.s32 4294967294, %s1366_s18   ;;  %s1366_s18 = sphi %s1413_s18, %s1737_s18   ;;  %s1362_s17 = sphi %s1411_s17, %s1736_s17   ;;  %s1358_s16 = sphi %s1409_s16, %s1735_s16   ;;  %s1354_s15 = sphi %s1407_s15, %s1734_s15  }
   0x9   : > { %s1432_s21 = sadd.s32 1, %s1366_s18   ;;  %s28_s22 = sadd.s32 1, %s1362_s17 }
   0xa   : > { %s25_s23 = ssub.s32 %s1366_s18, %s1432_s21  ;;  %p35_p0 = scmp.ne.s32.totalorder %s1362_s17, %s1358_s16 }
   0xb   : > { %p26_p1 = scmp.eq.s32.totalorder %s25_s23, 0  ;;  %p36_p2 = scmp.eq.s32.totalorder %s1366_s18, 0 }
   0xc   : > { %p41_p3 = scmp.ne.s32.totalorder %s1358_s16, %s1354_s15  ;;  %p42_p4 = scmp.eq.s32.totalorder %s1428_s19, 0 }
   0xd   : > { %s1444_s24 = scalar_select %p26_p1, %s1362_s17, %s28_s22  }
   0xe   : > { %p1446_p5 = por %p36_p2, %p35_p0  ;;  %p1452_p6 = por %p42_p4, %p41_p3 }
   0xf   : > { %p128_p7 = scmp.eq.s32.totalorder %s1428_s19, 1  ;;  %p134_p8 = scmp.eq.s32.totalorder %s987_s20, 1 }
  0x10   : > { %p988_p9 = scmp.ge.s32.totalorder %s1366_s18, 1  ;;  %p141_p10 = scmp.lt.s32.totalorder %s1366_s18, 3 }
  0x11   : > { %p1459_p11 = por %p128_p7, %p35_p0  ;;  %p1463_p12 = por %p134_p8, %p41_p3 }
  0x12   : > { %p1467_p13 = pnand %p988_p9, %p141_p10  ;;  %s1731_s3 = sld [smem:[#allocation12_spill]] }
  0x13   : > { %s1368_s7 = smov [#allocation6]   ;;  %p1184_p3 = scmp.lt.s32.totalorder %s1366_s18, 2 }
  0x14   : > { %p1171_p1 = pneg %p1467_p13  ;;  %s161_s8 = sshll.u32 %s1368_s7, 4  ;;  %s162_s8 = int_to_ptr.vmem [resolvable:$true] %s161_s8 }
  0x15   : > { %s172_s9 = sand.u32 1, %s1362_s17   ;;  %p1483_p7 = pnand %p1184_p3, %p1446_p5 }
  0x16   : > { %p1172_p2 = pnand %p1171_p1, %p42_p4  ;;  %s1158_s11 = smul.u32 24, %s172_s9 }
  0x17   : > { %s1159_s12 = smul.u32 24, %s1366_s18  ;;  %s173_s5 = scalar_lea.sflag [#allocation4], %s172_s9 }
  0x18   : > { %s159_s6 = sshll.u32 %s1731_s3, 4  ;;  %s176_s22 = scalar_lea.vmem [#allocation3], %s1158_s11  ;;  %s160_s6 = int_to_ptr.hbm [resolvable:$true] %s159_s6 }
  0x19   : > { %1174 = dma.hbm_to_vmem [thread:$0]  (!%p1172_p2), %s160_s6, 48, %s162_s8, [#allocation7]  }
  0x1a   : > { %s181_s20 = scalar_lea.hbm %s1720_s0, %s1159_s12  ;;  %s184_s23 = sshll.u32 %s176_s22, 4  ;;  %s185_s23 = int_to_ptr.vmem [resolvable:$true] %s184_s23 }
  0x1b   : > { %s182_s30 = sshll.u32 %s181_s20, 4  ;;  %p1270_p8 = pneg %p1483_p7  ;;  %s183_s30 = int_to_ptr.hbm [resolvable:$true] %s182_s30 }
  0x1c   : > { %s1266_s7 = sshra.s32 %s183_s30, 4  ;;  %s1273_s3 = scalar_lea.hbm %s1720_s0, 48  ;;  %s1267_s7 = int_to_ptr.hbm [resolvable:$true] %s1266_s7 }
  0x1d   : > { %s1268_s25 = scalar_lea.hbm %s1267_s7, 24  ;;  %p1274_p1 = scmp.lt.s32.totalorder %s1267_s7, %s1720_s0 }
  0x1e   : > { %p1269_p5 = scmp.ne.s32.totalorder %s1267_s7, %s1268_s25  ;;  %p1275_p2 = scmp.lt.s32.totalorder %s1273_s3, %s1268_s25 }
  0x20   : > { %p1271_p9 = pnand %p1270_p8, %p1269_p5  ;;  %p1276_p3 = por %p1275_p2, %p1274_p1 }
  0x22   : > { %p1272_p10 = pneg %p1271_p9 }
  0x24   : > { %p1277_p0 = pnand %p1276_p3, %p1272_p10 }
  0x26   : > { %1280 = shalt.err (!%p1277_p0)
}
  0x27   : > { %s1369_s9 = smov 192   ;;  %s1370_s11 = smov 12  }
  0x28   : > { %1178 = dma.hbm_to_vmem [thread:$0]  (!%p1483_p7), %s183_s30, 384, %s185_s23, %s173_s5, %s1369_s9, %s1369_s9, %s1370_s11  }
  0x29   : > { %196 = sbr.rel (%p1467_p13) target bundleno = 432 (0x1b0), region = 36  ;;  %s1504_s14 = sand.u32 (!%p1467_p13), 1, %s1358_s16  }
  0x2a   : > { %s1160_s20 = smul.u32 (!%p1467_p13), 24, %s1504_s14  ;;  %s199_s22 = scalar_lea.sflag (!%p1467_p13), [#allocation4], %s1504_s14 }
  0x2c   : > { %s1508_s3 = scalar_lea.vmem (!%p1467_p13), [#allocation3], %s1160_s20 }
  0x2e   : > { %1341 = dma.done.wait (%p1452_p6), %s199_s22, 384  }
  0x2f   : > { %1343 = vsyncadd (%p1452_p6), %s199_s22, 4294966912 }
  0x30   : > { %1345 = dma.done.wait (%p42_p4), [#allocation7], 48  }
  0x31   : > { %1347 = vsyncadd (%p42_p4), [#allocation7], 4294967248  ;;  %v477_v0 = vld [vmem:[%s1508_s3 + $0xc] sm:$0xff]  ;;  %v475_v1 = vld [vmem:[%s1508_s3] sm:$0xff]  ;;  %s1371_s29 = smov 90   ;;  %s1372_s26 = smov 91  }
  0x32   : > { %487 = vrot.lane.b32.xlu1 %v477_v0, %s1371_s29  ;;  %483 = vrot.lane.b32.xlu0 %v475_v1, %s1371_s29  ;;  %238 = vst [vmem:[#allocation2] sm:$0xff] %v475_v1  ;;  %v478_v2 = vld [vmem:[%s1508_s3 + $0x14] sm:$0xf]  ;;  %v476_v3 = vld [vmem:[%s1508_s3 + $0x8] sm:$0xf]  ;;  %s1373_s10 = smov 92  }
  0x33   : > { %450 = vrot.lane.b32.xlu2 %v475_v1, %s1372_s26  ;;  %241 = vst [vmem:[#allocation2 + $0xc] sm:$0xff] %v477_v0  ;;  %v443_v4 = vld [vmem:[%s1508_s3 + $0x8] sm:$0xf]  ;;  %v445_v5 = vld [vmem:[%s1508_s3 + $0x14] sm:$0xf]  ;;  %s1374_s23 = smov 108  }
  0x34   : > { %v410_v6 = vld [vmem:[%s1508_s3 + $0x8] sm:$0xf]  ;;  %v412_v7 = vld [vmem:[%s1508_s3 + $0x14] sm:$0xf]  ;;  %s1375_s30 = smov 109   ;;  %s1376_s5 = smov 110  }
  0x35   : > { %v377_v8 = vld [vmem:[%s1508_s3 + $0x8] sm:$0xf]  ;;  %v379_v9 = vld [vmem:[%s1508_s3 + $0x14] sm:$0xf]  ;;  %s1377_s7 = smov 126   ;;  %s1378_s25 = smov 127  }
  0x36   : > { %v344_v10 = vld [vmem:[%s1508_s3 + $0x8] sm:$0xf]  ;;  %v346_v11 = vld [vmem:[%s1508_s3 + $0x14] sm:$0xf]  ;;  %vm239_vm0 = vcmask 257024   ;;  %vm263_vm1 = vcmask 1043456  }
  0x37   : > { %v311_v12 = vld [vmem:[%s1508_s3 + $0x8] sm:$0xf]  ;;  %v313_v13 = vld [vmem:[%s1508_s3 + $0x14] sm:$0xf]  ;;  %vm463_vm2 = vcmask 744448   ;;  %vm496_vm3 = vcmask 736256  }
  0x38   : > { %v278_v14 = vld [vmem:[%s1508_s3 + $0x8] sm:$0xf]  ;;  %v280_v15 = vld [vmem:[%s1508_s3 + $0x14] sm:$0xf]  ;;  %vm430_vm4 = vcmask 752640   ;;  %vm734_vm5 = vcmask 130048  }
  0x39   : > { %v244_v16 = vld [vmem:[%s1508_s3 + $0x8] sm:$0xf]  ;;  %v246_v17 = vld [vmem:[%s1508_s3 + $0x14] sm:$0xf]  ;;  %vm397_vm6 = vcmask 883712   ;;  %vm364_vm7 = vcmask 891904  }
  0x3a   : > { %489 = vrot.lane.b32.xlu1 %v478_v2, %s1371_s29  ;;  %485 = vrot.lane.b32.xlu0 %v476_v3, %s1371_s29  ;;  %vm331_vm8 = vcmask 900096   ;;  %vm298_vm9 = vcmask 1031168   ;;  %vm265_vm10 = vcmask 1039360   ;;  %s1161_s22 = smul.u32 96, %s1504_s14  ;;  %vm877_vm11 = vcmask 261120   ;;  %s1316_s13 = scalar_lea.hbm %s1724_s4, 192 }
  0x3b   : > { %452 = vrot.lane.b32.xlu2 %v443_v4, %s1372_s26  ;;  %s1162_s29 = smul.u32 96, %s1428_s19 }
  0x42   : > { %456 = vrot.lane.b32.xlu1 %v445_v5, %s1372_s26  ;;  %454 = vrot.lane.b32.xlu0 %v477_v0, %s1372_s26 }
  0x43   : > { %417 = vrot.lane.b32.xlu2 %v475_v1, %s1373_s10 }
  0x4a   : > { %421 = vrot.lane.b32.xlu1 %v477_v0, %s1373_s10  ;;  %419 = vrot.lane.b32.xlu0 %v410_v6, %s1373_s10 }
  0x4b   : > { %423 = vrot.lane.b32.xlu2 %v412_v7, %s1373_s10 }
  0x52   : > { %386 = vrot.lane.b32.xlu1 %v377_v8, %s1374_s23  ;;  %384 = vrot.lane.b32.xlu0 %v475_v1, %s1374_s23 }
  0x53   : > { %388 = vrot.lane.b32.xlu2 %v477_v0, %s1374_s23 }
  0x5a   : > { %390 = vrot.lane.b32.xlu0 %v379_v9, %s1374_s23  ;;  %351 = vrot.lane.b32.xlu1 %v475_v1, %s1375_s30  ;;  %s900_s23 = scalar_lea.hbm %s1724_s4, %s1162_s29 }
  0x5b   : > { %353 = vrot.lane.b32.xlu2 %v344_v10, %s1375_s30 }
  0x62   : > { %355 = vrot.lane.b32.xlu0 %v477_v0, %s1375_s30  ;;  %357 = vrot.lane.b32.xlu1 %v346_v11, %s1375_s30  ;;  %s903_s30 = sshll.u32 %s900_s23, 4  ;;  %s904_s30 = int_to_ptr.hbm [resolvable:$true] %s903_s30 }
  0x63   : > { %318 = vrot.lane.b32.xlu2 %v475_v1, %s1376_s5 }
  0x6a   : > { %322 = vrot.lane.b32.xlu1 %v477_v0, %s1376_s5  ;;  %320 = vrot.lane.b32.xlu0 %v311_v12, %s1376_s5  ;;  %v1127_v12 = vld [vmem:[%s1721_s1 + $0x4] sm:$0xf] }
  0x6b   : > { %324 = vrot.lane.b32.xlu2 %v313_v13, %s1376_s5  ;;  %v998_v13 = vld [vmem:[%s1721_s1 + $0x8] sm:$0xf0]  ;;  %s889_s5 = scalar_lea.sflag [#allocation5], %s1504_s14 }
  0x72   : > { %287 = vrot.lane.b32.xlu1 %v278_v14, %s1377_s7  ;;  %285 = vrot.lane.b32.xlu0 %v475_v1, %s1377_s7  ;;  %v1564_v14 = vor.u32 %v1127_v12, %v998_v13 }
  0x73   : > { %289 = vrot.lane.b32.xlu2 %v477_v0, %s1377_s7 }
  0x7a   : > { %291 = vrot.lane.b32.xlu0 %v280_v15, %s1377_s7  ;;  %251 = vrot.lane.b32.xlu1 %v475_v1, %s1378_s25  ;;  %s1310_s7 = sshra.s32 %s904_s30, 4  ;;  %s1311_s7 = int_to_ptr.hbm [resolvable:$true] %s1310_s7 }
  0x7b   : > { %253 = vrot.lane.b32.xlu2 %v244_v16, %s1378_s25  ;;  %p1317_p0 = scmp.lt.s32.totalorder %s1311_s7, %s1724_s4 }
  0x82   : > { %255 = vrot.lane.b32.xlu0 %v477_v0, %s1378_s25  ;;  %257 = vrot.lane.b32.xlu1 %v246_v17, %s1378_s25  ;;  %s1312_s25 = scalar_lea.hbm %s1311_s7, 96 }
  0x83   : > { %p1313_p4 = scmp.ne.s32.totalorder %s1311_s7, %s1312_s25  ;;  %p1318_p7 = scmp.lt.s32.totalorder %s1316_s13, %s1312_s25 }
  0x85   : > { %p1314_p6 = pnand %p1313_p4, %p1459_p11  ;;  %p1319_p5 = por %p1318_p7, %p1317_p0 }
  0x87   : > { %p1315_p13 = pneg %p1314_p6 }
  0x89   : > { %p1320_p8 = pnand %p1319_p5, %p1315_p13 }
  0x8d   : > { %v451_v18 = vpop.permute.xlu2 %450 }
  0x8e   : > { %v458_v19 = vrot.slane %v451_v18, 4 }
  0x95   : > { %v453_v20 = vpop.permute.xlu2 %452 }
  0x96   : > { %v459_v21 = vrot.slane %v453_v20, 4  ;;  %472 = vst.msk [vmem:[#allocation2 + $0xb0] sm:$0xf] %vm239_vm0, %v453_v20 }
  0x98   : > { %v462_v22 = vsel %vm263_vm1, %v458_v19, %v459_v21 }
  0x99   : > { %v464_v23 = vsel %vm463_vm2, %v451_v18, %v462_v22 }
  0x9a   : > { %471 = vst [vmem:[#allocation2 + $0xa8] sm:$0xff] %v464_v23 }
  0x9d   : > { %v418_v24 = vpop.permute.xlu2 %417  ;;  %v1104_v54 = vld [vmem:[#allocation2 + $0xb0] sm:$0xf] }
  0x9e   : > { %v425_v55 = vrot.slane %v418_v24, 4 }
  0xa1   : > { %v1096_v3 = vld [vmem:[#allocation2 + $0xa8] sm:$0xf]  ;;  %v1152_v7 = vld [vmem:[#allocation2 + $0xac] sm:$0xf] }
  0xa4   : > { %v488_v25 = vpop.permute.xlu1 %487  ;;  %v484_v26 = vpop.permute.xlu0 %483 }
  0xa5   : > { %v424_v27 = vpop.permute.xlu2 %423  ;;  %v493_v30 = vrot.slane %v488_v25, 4  ;;  %v491_v31 = vrot.slane %v484_v26, 4 }
  0xa6   : > { %441 = vst.msk [vmem:[#allocation2 + $0xa4] sm:$0xf] %vm239_vm0, %v424_v27  ;;  %v428_v57 = vrot.slane %v424_v27, 4 }
  0xac   : > { %v490_v28 = vpop.permute.xlu1 %489  ;;  %v486_v29 = vpop.permute.xlu0 %485 }
  0xad   : > { %v494_v32 = vrot.slane %v490_v28, 4  ;;  %507 = vst.msk [vmem:[#allocation2 + $0xd4] sm:$0xf] %vm239_vm0, %v490_v28  ;;  %v492_v33 = vrot.slane %v486_v29, 4  ;;  %v1541_v34 = vpop.permute.xlu2 %388  ;;  %v1151_v11 = vld [vmem:[#allocation2 + $0xa0] sm:$0xf0] }
  0xae   : > { %505 = vst.msk [vmem:[#allocation2 + $0xc8] sm:$0xf] %vm239_vm0, %v486_v29 }
  0xaf   : > { %v498_v35 = vsel %vm263_vm1, %v493_v30, %v494_v32  ;;  %v495_v36 = vsel %vm263_vm1, %v491_v31, %v492_v33  ;;  %v394_v30 = vrot.slane %v1541_v34, 4 }
  0xb0   : > { %v499_v37 = vsel %vm496_vm3, %v488_v25, %v498_v35  ;;  %v497_v38 = vsel %vm496_vm3, %v484_v26, %v495_v36 }
  0xb1   : > { %506 = vst [vmem:[#allocation2 + $0xcc] sm:$0xff] %v499_v37 }
  0xb2   : > { %504 = vst [vmem:[#allocation2 + $0xc0] sm:$0xff] %v497_v38 }
  0xb4   : > { %v457_v39 = vpop.permute.xlu1 %456  ;;  %v455_v40 = vpop.permute.xlu0 %454  ;;  %v1157_v45 = vld [vmem:[#allocation2 + $0xd0] sm:$0xf0] }
  0xb5   : > { %v461_v41 = vrot.slane %v457_v39, 4  ;;  %474 = vst.msk [vmem:[#allocation2 + $0xbc] sm:$0xf] %vm239_vm0, %v457_v39  ;;  %v460_v42 = vrot.slane %v455_v40, 4  ;;  %v1547_v43 = vpop.permute.xlu2 %353  ;;  %v1116_v49 = vld [vmem:[#allocation2 + $0xc8] sm:$0xf] }
  0xb6   : > { %373 = vst.msk [vmem:[#allocation2 + $0x68] sm:$0xf] %vm239_vm0, %v1547_v43  ;;  %v1117_v56 = vor.u32 %v1157_v45, %v1116_v49  ;;  %v360_v31 = vrot.slane %v1547_v43, 4  ;;  %v1006_v43 = vld [vmem:[%s1721_s1 + $0x18] sm:$0xf0] }
  0xb7   : > { %v465_v44 = vsel %vm263_vm1, %v460_v42, %v461_v41  ;;  %v1129_v42 = vld [vmem:[%s1721_s1 + $0x14] sm:$0xf] }
  0xb8   : > { %v466_v46 = vsel %vm463_vm2, %v455_v40, %v465_v44  ;;  %v1156_v47 = vld [vmem:[#allocation2 + $0xc8] sm:$0xf0]  ;;  %v1110_v48 = vld [vmem:[#allocation2 + $0xcc] sm:$0xf0]  ;;  %v1593_v44 = vor.u32 %v1129_v42, %v1006_v43 }
  0xb9   : > { %473 = vst [vmem:[#allocation2 + $0xb4] sm:$0xff] %v466_v46  ;;  %v1108_v50 = vld [vmem:[#allocation2 + $0xc0] sm:$0xf]  ;;  %v1155_v51 = vld [vmem:[#allocation2 + $0xc4] sm:$0xf] }
  0xba   : > { %v1109_v52 = vor.u32 %v1156_v47, %v1108_v50  ;;  %v1113_v53 = vor.u32 %v1155_v51, %v1110_v48 }
  0xbc   : > { %767 = vmatpush.bf16.msra.mxu1 %v1109_v52  ;;  %805 = vmatpush.bf16.msra.mxu3 %v1113_v53  ;;  %v422_v58 = vpop.permute.xlu1 %421  ;;  %v420_v59 = vpop.permute.xlu0 %419  ;;  %v1154_v60 = vld [vmem:[#allocation2 + $0xb8] sm:$0xf0] }
  0xbd   : > { %v427_v61 = vrot.slane %v422_v58, 4  ;;  %v426_v62 = vrot.slane %v420_v59, 4  ;;  %439 = vst.msk [vmem:[#allocation2 + $0x98] sm:$0xf] %vm239_vm0, %v420_v59  ;;  %v1105_v63 = vor.u32 %v1154_v60, %v1104_v54  ;;  %v1554_v0 = vpop.permute.xlu2 %318  ;;  %v1068_v60 = vld [vmem:[#allocation2 + $0x68] sm:$0xf] }
  0xbf   : > { %v429_v1 = vsel %vm263_vm1, %v425_v55, %v426_v62  ;;  %v432_v2 = vsel %vm263_vm1, %v427_v61, %v428_v57  ;;  %1120 = vmatmul.msk.bf16.vlgmr.msra.gmra.mxu3 %vm734_vm5, %v1564_v14  ;;  %1118 = vmatmul.msk.bf16.vlgmr.msra.gmra.mxu1 %vm734_vm5, %v1564_v14  ;;  %v326_v61 = vrot.slane %v1554_v0, 4 }
  0xc0   : > { %843 = vmatpush.bf16.msrb.mxu3 %v1117_v56  ;;  %817 = vmatpush.bf16.msrb.mxu1 %v1105_v63  ;;  %v431_v4 = vsel %vm430_vm4, %v418_v24, %v429_v1  ;;  %v433_v5 = vsel %vm430_vm4, %v422_v58, %v432_v2  ;;  %v1153_v6 = vld [vmem:[#allocation2 + $0xb0] sm:$0xf0]  ;;  %v1098_v8 = vld [vmem:[#allocation2 + $0xb4] sm:$0xf0]  ;;  %v237_v1 = vld [vmem:[%s1508_s3 + $0x14] sm:$0xf] }
  0xc1   : > { %438 = vst [vmem:[#allocation2 + $0x90] sm:$0xff] %v431_v4  ;;  %v1097_v9 = vor.u32 %v1153_v6, %v1096_v3  ;;  %v1101_v10 = vor.u32 %v1152_v7, %v1098_v8  ;;  %v235_v63 = vld [vmem:[%s1508_s3 + $0x8] sm:$0xf]  ;;  %s1665_s3 = scalar_lea.vmem [#allocation8], %s1161_s22 }
  0xc2   : > { %440 = vst [vmem:[#allocation2 + $0x9c] sm:$0xff] %v433_v5  ;;  %s901_s19 = sshll.u32 %s1665_s3, 4  ;;  %s902_s19 = int_to_ptr.vmem [resolvable:$true] %s901_s19 }
  0xc3   : > { %741 = vmatpush.bf16.msra.mxu0 %v1097_v9  ;;  %779 = vmatpush.bf16.msra.mxu2 %v1101_v10  ;;  %240 = vst.msk [vmem:[#allocation2 + $0x8] sm:$0xf] %vm239_vm0, %v235_v63 }
  0xc4   : > { %v387_v15 = vpop.permute.xlu1 %386  ;;  %v385_v16 = vpop.permute.xlu0 %384  ;;  %v1092_v17 = vld [vmem:[#allocation2 + $0x98] sm:$0xf]  ;;  %242 = vst.msk [vmem:[#allocation2 + $0x14] sm:$0xf] %vm239_vm0, %v237_v1 }
  0xc5   : > { %v393_v18 = vrot.slane %v387_v15, 4  ;;  %406 = vst.msk [vmem:[#allocation2 + $0x80] sm:$0xf] %vm239_vm0, %v387_v15  ;;  %v392_v19 = vrot.slane %v385_v16, 4  ;;  %v1093_v20 = vor.u32 %v1151_v11, %v1092_v17  ;;  %v1567_v21 = vpop.permute.xlu2 %324 }
  0xc6   : > { %342 = vst.msk [vmem:[#allocation2 + $0x5c] sm:$0xf] %vm239_vm0, %v1567_v21  ;;  %v329_v62 = vrot.slane %v1567_v21, 4 }
  0xc7   : > { %v396_v22 = vsel %vm263_vm1, %v392_v19, %v393_v18  ;;  %818 = vmatpush.bf16.msrb.mxu1 %v1093_v20 }
  0xc8   : > { %v398_v23 = vsel %vm397_vm6, %v385_v16, %v396_v22  ;;  %v1084_v24 = vld [vmem:[#allocation2 + $0x90] sm:$0xf]  ;;  %v1149_v25 = vld [vmem:[#allocation2 + $0x94] sm:$0xf] }
  0xc9   : > { %405 = vst [vmem:[#allocation2 + $0x78] sm:$0xff] %v398_v23  ;;  %v1150_v26 = vld [vmem:[#allocation2 + $0x98] sm:$0xf0]  ;;  %v1086_v27 = vld [vmem:[#allocation2 + $0x9c] sm:$0xf0] }
  0xca   : > { %v1085_v28 = vor.u32 %v1150_v26, %v1084_v24  ;;  %v1089_v29 = vor.u32 %v1149_v25, %v1086_v27  ;;  %v1020_v1 = vld [vmem:[#allocation2 + $0x8] sm:$0xf] }
  0xcc   : > { %742 = vmatpush.bf16.msra.mxu0 %v1085_v28  ;;  %780 = vmatpush.bf16.msra.mxu2 %v1089_v29  ;;  %v391_v32 = vpop.permute.xlu0 %390  ;;  %v352_v33 = vpop.permute.xlu1 %351  ;;  %v1080_v47 = vld [vmem:[#allocation2 + $0x80] sm:$0xf] }
  0xcd   : > { %v395_v35 = vrot.slane %v391_v32, 4  ;;  %408 = vst.msk [vmem:[#allocation2 + $0x8c] sm:$0xf] %vm239_vm0, %v391_v32  ;;  %v359_v36 = vrot.slane %v352_v33, 4  ;;  %v1580_v37 = vpop.permute.xlu2 %289  ;;  %v1142_v19 = vld [vmem:[#allocation2 + $0x58] sm:$0xf0] }
  0xcf   : > { %v399_v38 = vsel %vm263_vm1, %v394_v30, %v395_v35  ;;  %v363_v39 = vsel %vm263_vm1, %v359_v36, %v360_v31  ;;  %1121 = vmatmul.msk.bf16.gmra.mxu3 %vm734_vm5, %v1593_v44  ;;  %1119 = vmatmul.msk.bf16.gmra.mxu1 %vm734_vm5, %v1593_v44 }
  0xd0   : > { %v400_v40 = vsel %vm397_vm6, %v1541_v34, %v399_v38  ;;  %v365_v41 = vsel %vm364_vm7, %v352_v33, %v363_v39  ;;  %v1072_v53 = vld [vmem:[#allocation2 + $0x78] sm:$0xf]  ;;  %v1146_v56 = vld [vmem:[#allocation2 + $0x7c] sm:$0xf]  ;;  %v295_v33 = vrot.slane %v1580_v37, 4 }
  0xd1   : > { %407 = vst [vmem:[#allocation2 + $0x84] sm:$0xff] %v400_v40 }
  0xd2   : > { %372 = vst [vmem:[#allocation2 + $0x60] sm:$0xff] %v365_v41 }
  0xd4   : > { %v356_v45 = vpop.permute.xlu0 %355  ;;  %v358_v46 = vpop.permute.xlu1 %357  ;;  %v1148_v48 = vld [vmem:[#allocation2 + $0x88] sm:$0xf0] }
  0xd5   : > { %v361_v49 = vrot.slane %v356_v45, 4  ;;  %v362_v34 = vrot.slane %v358_v46, 4  ;;  %375 = vst.msk [vmem:[#allocation2 + $0x74] sm:$0xf] %vm239_vm0, %v358_v46  ;;  %v1081_v50 = vor.u32 %v1148_v48, %v1080_v47  ;;  %v1596_v51 = vpop.permute.xlu2 %253 }
  0xd6   : > { %274 = vst.msk [vmem:[#allocation2 + $0x20] sm:$0xf] %vm239_vm0, %v1596_v51  ;;  %v260_v35 = vrot.slane %v1596_v51, 4 }
  0xd7   : > { %v366_v52 = vsel %vm263_vm1, %v361_v49, %v362_v34  ;;  %819 = vmatpush.bf16.msrb.mxu1 %v1081_v50 }
  0xd8   : > { %v367_v54 = vsel %vm364_vm7, %v356_v45, %v366_v52  ;;  %v1147_v55 = vld [vmem:[#allocation2 + $0x80] sm:$0xf0]  ;;  %v1074_v57 = vld [vmem:[#allocation2 + $0x84] sm:$0xf0] }
  0xd9   : > { %374 = vst [vmem:[#allocation2 + $0x6c] sm:$0xff] %v367_v54  ;;  %v1073_v58 = vor.u32 %v1147_v55, %v1072_v53  ;;  %v1077_v59 = vor.u32 %v1146_v56, %v1074_v57  ;;  %v1060_v10 = vld [vmem:[#allocation2 + $0x60] sm:$0xf]  ;;  %v1143_v15 = vld [vmem:[#allocation2 + $0x64] sm:$0xf] }
  0xdb   : > { %743 = vmatpush.bf16.msra.mxu0 %v1073_v58  ;;  %781 = vmatpush.bf16.msra.mxu2 %v1077_v59  ;;  %v1379_v59 = vmov 0  }
  0xdc   : > { %v323_v2 = vpop.permute.xlu1 %322  ;;  %v321_v3 = vpop.permute.xlu0 %320  ;;  %v1145_v4 = vld [vmem:[#allocation2 + $0x70] sm:$0xf0]  ;;  %1234 = vset.pattern.permute.xlu0 %v1379_v59  ;;  %1235 = vset.pattern.permute.xlu1 %v1379_v59 }
  0xdd   : > { %v328_v5 = vrot.slane %v323_v2, 4  ;;  %v327_v6 = vrot.slane %v321_v3, 4  ;;  %340 = vst.msk [vmem:[#allocation2 + $0x50] sm:$0xf] %vm239_vm0, %v321_v3  ;;  %v1069_v7 = vor.u32 %v1145_v4, %v1068_v60  ;;  %v1032_v58 = vld [vmem:[#allocation2 + $0x20] sm:$0xf]  ;;  %1233 = vset.pattern.permute.xlu2 %v1379_v59 }
  0xde   : > { %v550_v60 = vld [vmem:[%s1722_s2 + $0x10] sm:$0xff]  ;;  %v1012_v3 = vld [vmem:[#allocation2] sm:$0xf]  ;;  %v1132_v4 = vld [vmem:[#allocation2 + $0x8] sm:$0xf0] }
  0xdf   : > { %v330_v8 = vsel %vm263_vm1, %v326_v61, %v327_v6  ;;  %v333_v9 = vsel %vm263_vm1, %v328_v5, %v329_v62  ;;  %820 = vmatpush.bf16.msrb.mxu1 %v1069_v7  ;;  %1122 = vmatmul.msk.bf16.vlgmr.msrb.gmra.mxu3 %vm734_vm5, %v1564_v14  ;;  %v548_v61 = vld [vmem:[%s1722_s2] sm:$0xff]  ;;  %v1014_v7 = vld [vmem:[#allocation2 + $0xc] sm:$0xf0] }
  0xe0   : > { %v332_v11 = vsel %vm331_vm8, %v1554_v0, %v330_v8  ;;  %v334_v12 = vsel %vm331_vm8, %v323_v2, %v333_v9  ;;  %v1144_v13 = vld [vmem:[#allocation2 + $0x68] sm:$0xf0]  ;;  %v1062_v16 = vld [vmem:[#allocation2 + $0x6c] sm:$0xf0]  ;;  %564 = vperm.xlu1 %1235, %v550_v60   ;;  %v1133_v2 = vld [vmem:[#allocation2 + $0x10] sm:$0xf0]  ;;  %554 = vperm.xlu2 %1233, %v548_v61  }
  0xe1   : > { %339 = vst [vmem:[#allocation2 + $0x48] sm:$0xff] %v332_v11  ;;  %v1061_v17 = vor.u32 %v1144_v13, %v1060_v10  ;;  %v1065_v18 = vor.u32 %v1143_v15, %v1062_v16  ;;  %v1131_v6 = vld [vmem:[#allocation2 + $0x4] sm:$0xf]  ;;  %v1021_v11 = vor.u32 %v1133_v2, %v1020_v1  ;;  %v996_v15 = vld [vmem:[%s1721_s1] sm:$0xf] }
  0xe2   : > { %341 = vst [vmem:[#allocation2 + $0x54] sm:$0xff] %v334_v12  ;;  %v1128_v16 = vld [vmem:[%s1721_s1 + $0x4] sm:$0xf0] }
  0xe3   : > { %744 = vmatpush.bf16.msra.mxu0 %v1061_v17  ;;  %782 = vmatpush.bf16.msra.mxu2 %v1065_v18  ;;  %v551_v17 = vld [vmem:[%s1722_s2 + $0x18] sm:$0xff]  ;;  %v1013_v18 = vor.u32 %v1132_v4, %v1012_v3 }
  0xe4   : > { %v288_v20 = vpop.permute.xlu1 %287  ;;  %v286_v21 = vpop.permute.xlu0 %285  ;;  %v1056_v22 = vld [vmem:[#allocation2 + $0x50] sm:$0xf] }
  0xe5   : > { %v294_v23 = vrot.slane %v288_v20, 4  ;;  %307 = vst.msk [vmem:[#allocation2 + $0x38] sm:$0xf] %vm239_vm0, %v288_v20  ;;  %v293_v24 = vrot.slane %v286_v21, 4  ;;  %v1057_v0 = vor.u32 %v1142_v19, %v1056_v22  ;;  %v1017_v19 = vor.u32 %v1131_v6, %v1014_v7  ;;  %v1130_v22 = vld [vmem:[%s1721_s1 + $0x14] sm:$0xf0] }
  0xe6   : > { %v997_v20 = vor.u32 %v1128_v16, %v996_v15 }
  0xe7   : > { %v297_v25 = vsel %vm263_vm1, %v293_v24, %v294_v23  ;;  %821 = vmatpush.bf16.msrb.mxu1 %v1057_v0 }
  0xe8   : > { %v299_v26 = vsel %vm298_vm9, %v286_v21, %v297_v25  ;;  %v1048_v27 = vld [vmem:[#allocation2 + $0x48] sm:$0xf]  ;;  %v1140_v28 = vld [vmem:[#allocation2 + $0x4c] sm:$0xf]  ;;  %569 = vperm.xlu2 %1233, %v551_v17   ;;  %v1004_v21 = vld [vmem:[%s1721_s1 + $0x10] sm:$0xf] }
  0xe9   : > { %306 = vst [vmem:[#allocation2 + $0x30] sm:$0xff] %v299_v26  ;;  %v1141_v29 = vld [vmem:[#allocation2 + $0x50] sm:$0xf0]  ;;  %v1050_v30 = vld [vmem:[#allocation2 + $0x54] sm:$0xf0]  ;;  %v1005_v23 = vor.u32 %v1130_v22, %v1004_v21 }
  0xea   : > { %v1049_v31 = vor.u32 %v1141_v29, %v1048_v27  ;;  %v1053_v32 = vor.u32 %v1140_v28, %v1050_v30 }
  0xec   : > { %745 = vmatpush.bf16.msra.mxu0 %v1049_v31  ;;  %783 = vmatpush.bf16.msra.mxu2 %v1053_v32  ;;  %v292_v36 = vpop.permute.xlu0 %291  ;;  %v252_v14 = vpop.permute.xlu1 %251  ;;  %v1044_v47 = vld [vmem:[#allocation2 + $0x38] sm:$0xf] }
  0xed   : > { %v296_v38 = vrot.slane %v292_v36, 4  ;;  %309 = vst.msk [vmem:[#allocation2 + $0x44] sm:$0xf] %vm239_vm0, %v292_v36  ;;  %v259_v39 = vrot.slane %v252_v14, 4 }
  0xef   : > { %v300_v40 = vsel %vm263_vm1, %v295_v33, %v296_v38  ;;  %v264_v41 = vsel %vm263_vm1, %v259_v39, %v260_v35  ;;  %1123 = vmatmul.msk.bf16.gmra.mxu3 %vm734_vm5, %v1593_v44  ;;  %v549_v44 = vld [vmem:[%s1722_s2 + $0x8] sm:$0xff] }
  0xf0   : > { %v301_v42 = vsel %vm298_vm9, %v1580_v37, %v300_v40  ;;  %v266_v43 = vsel %vm265_vm10, %v252_v14, %v264_v41  ;;  %v1036_v37 = vld [vmem:[#allocation2 + $0x30] sm:$0xf]  ;;  %v1137_v52 = vld [vmem:[#allocation2 + $0x34] sm:$0xf]  ;;  %559 = vperm.xlu0 %1234, %v549_v44   ;;  %v855_v33 = vld [vmem:[#allocation6] sm:$0x7] }
  0xf1   : > { %308 = vst [vmem:[#allocation2 + $0x3c] sm:$0xff] %v301_v42  ;;  %v859_v36 = vperm.slane %v855_v33, 2  ;;  %v857_v41 = vperm.slane %v855_v33, 0 }
  0xf2   : > { %273 = vst [vmem:[#allocation2 + $0x18] sm:$0xff] %v266_v43 }
  0xf4   : > { %v256_v45 = vpop.permute.xlu0 %255  ;;  %v258_v46 = vpop.permute.xlu1 %257  ;;  %v1139_v48 = vld [vmem:[#allocation2 + $0x40] sm:$0xf0] }
  0xf5   : > { %v261_v49 = vrot.slane %v256_v45, 4  ;;  %v262_v34 = vrot.slane %v258_v46, 4  ;;  %276 = vst.msk [vmem:[#allocation2 + $0x2c] sm:$0xf] %vm239_vm0, %v258_v46  ;;  %v1045_v50 = vor.u32 %v1139_v48, %v1044_v47 }
  0xf7   : > { %v267_v51 = vsel %vm263_vm1, %v261_v49, %v262_v34  ;;  %822 = vmatpush.bf16.msrb.mxu1 %v1045_v50  ;;  %v858_v50 = vperm.slane %v855_v33, 1 }
  0xf8   : > { %v268_v53 = vsel %vm265_vm10, %v256_v45, %v267_v51  ;;  %v1138_v54 = vld [vmem:[#allocation2 + $0x38] sm:$0xf0]  ;;  %v1038_v55 = vld [vmem:[#allocation2 + $0x3c] sm:$0xf0] }
  0xf9   : > { %275 = vst [vmem:[#allocation2 + $0x24] sm:$0xff] %v268_v53  ;;  %v1037_v56 = vor.u32 %v1138_v54, %v1036_v37  ;;  %v1041_v57 = vor.u32 %v1137_v52, %v1038_v55  ;;  %v1024_v5 = vld [vmem:[#allocation2 + $0x18] sm:$0xf]  ;;  %v1134_v9 = vld [vmem:[#allocation2 + $0x1c] sm:$0xf] }
  0xfb   : > { %746 = vmatpush.bf16.msra.mxu0 %v1037_v56  ;;  %784 = vmatpush.bf16.msra.mxu2 %v1041_v57 }
  0xfc   : > { %v1136_v62 = vld [vmem:[#allocation2 + $0x28] sm:$0xf0] }
  0xfd   : > { %v1033_v63 = vor.u32 %v1136_v62, %v1032_v58 }
  0xff   : > { %823 = vmatpush.bf16.msrb.mxu1 %v1033_v63 }
 0x100   : > { %v1135_v8 = vld [vmem:[#allocation2 + $0x20] sm:$0xf0]  ;;  %v1026_v10 = vld [vmem:[#allocation2 + $0x24] sm:$0xf0] }
 0x101   : > { %v1025_v12 = vor.u32 %v1135_v8, %v1024_v5  ;;  %v1029_v13 = vor.u32 %v1134_v9, %v1026_v10 }
 0x103   : > { %747 = vmatpush.bf16.msra.mxu0 %v1025_v12  ;;  %785 = vmatpush.bf16.msra.mxu2 %v1029_v13 }
 0x104   : > { %824 = vmatpush.bf16.msrb.mxu1 %v1021_v11 }
 0x107   : > { %748 = vmatpush.bf16.msra.mxu0 %v1013_v18  ;;  %786 = vmatpush.bf16.msra.mxu2 %v1017_v19 }
 0x108   : > { %825 = vmatmul.bf16.vlgmr.msrb.gmra.mxu1 %v997_v20 }
 0x10a   : > { %749 = vmatmul.bf16.vlgmr.msra.gmra.mxu0 %v997_v20  ;;  %787 = vmatmul.bf16.vlgmr.msra.gmra.mxu2 %v997_v20 }
 0x118   : > { %830 = vmatmul.bf16.gmra.mxu1 %v1005_v23 }
 0x11a   : > { %754 = vmatmul.bf16.gmra.mxu0 %v1005_v23  ;;  %792 = vmatmul.bf16.gmra.mxu2 %v1005_v23 }
 0x13a   : > { %v555_v35 = vpop.permute.xlu2 %554 }
 0x13c   : > { %v769_v0 = vpop.f32.mrf.mxu1 }
 0x142   : > { %v807_v24 = vpop.f32.mrf.mxu3  ;;  %v570_v8 = vpop.permute.xlu2 %569 }
 0x144   : > { %v771_v26 = vpop.f32.mrf.mxu1 }
 0x14a   : > { %v809_v25 = vpop.f32.mrf.mxu3 }
 0x14c   : > { %v774_v28 = vpop.f32.mrf.mxu1 }
 0x152   : > { %v1658_v27 = vpop.f32.mrf.mxu3  ;;  %v565_v44 = vpop.permute.xlu1 %564 }
 0x154   : > { %v1662_v30 = vpop.f32.mrf.mxu1 }
 0x15a   : > { %v1660_v29 = vpop.f32.mrf.mxu3 }
 0x162   : > { %v845_v31 = vpop.f32.mrf.mxu3  ;;  %v560_v46 = vpop.permute.xlu0 %559 }
 0x16a   : > { %v847_v42 = vpop.f32.mrf.mxu3 }
 0x172   : > { %v850_v58 = vpop.f32.mrf.mxu3 }
 0x17a   : > { %v852_v10 = vpop.f32.mrf.mxu3 }
 0x185   : > { %v826_v32 = vpop.f32.mrf.mxu1 }
 0x186   : > { %v827_v14 = vadd.f32 %v826_v32, %v555_v35 }
 0x187   : > { %v750_v38 = vpop.f32.mrf.mxu0 }
 0x188   : > { %v846_v39 = vadd.f32 %v845_v31, %v827_v14  ;;  %v751_v40 = vadd.f32 %v750_v38, %v555_v35 }
 0x18a   : > { %v865_v43 = vmul.f32 %v859_v36, %v846_v39  ;;  %v770_v45 = vadd.f32 %v769_v0, %v751_v40 }
 0x18c   : > { %v863_v47 = vmul.f32 %v857_v41, %v770_v45  ;;  %878 = vst.msk [vmem:[%s1665_s3 + $0x10] sm:$0xff] %vm877_vm11, %v865_v43 }
 0x18d   : > { %v788_v48 = vpop.f32.mrf.mxu2  ;;  %v828_v49 = vpop.f32.mrf.mxu1 }
 0x18e   : > { %875 = vst [vmem:[%s1665_s3] sm:$0xff] %v863_v47  ;;  %v789_v34 = vadd.f32 %v788_v48, %v555_v35  ;;  %v829_v51 = vadd.f32 %v828_v49, %v560_v46 }
 0x18f   : > { %v752_v37 = vpop.f32.mrf.mxu0 }
 0x190   : > { %v808_v52 = vadd.f32 %v807_v24, %v789_v34  ;;  %v753_v53 = vadd.f32 %v752_v37, %v560_v46  ;;  %v848_v54 = vadd.f32 %v847_v42, %v829_v51 }
 0x192   : > { %v864_v55 = vmul.f32 %v858_v50, %v808_v52  ;;  %v772_v56 = vadd.f32 %v771_v26, %v753_v53  ;;  %v868_v57 = vmul.f32 %v859_v36, %v848_v54 }
 0x194   : > { %876 = vst [vmem:[%s1665_s3 + $0x8] sm:$0xff] %v864_v55  ;;  %v866_v59 = vmul.f32 %v857_v41, %v772_v56 }
 0x195   : > { %881 = vst.msk [vmem:[%s1665_s3 + $0x28] sm:$0xff] %vm877_vm11, %v868_v57  ;;  %v790_v60 = vpop.f32.mrf.mxu2  ;;  %v831_v61 = vpop.f32.mrf.mxu1 }
 0x196   : > { %879 = vst [vmem:[%s1665_s3 + $0x18] sm:$0xff] %v866_v59  ;;  %v791_v62 = vadd.f32 %v790_v60, %v560_v46  ;;  %v832_v63 = vadd.f32 %v831_v61, %v565_v44 }
 0x197   : > { %v755_v1 = vpop.f32.mrf.mxu0 }
 0x198   : > { %v810_v2 = vadd.f32 %v809_v25, %v791_v62  ;;  %v851_v3 = vadd.f32 %v850_v58, %v832_v63  ;;  %v756_v4 = vadd.f32 %v755_v1, %v565_v44 }
 0x19a   : > { %v867_v5 = vmul.f32 %v858_v50, %v810_v2  ;;  %v871_v6 = vmul.f32 %v859_v36, %v851_v3  ;;  %v775_v7 = vadd.f32 %v774_v28, %v756_v4 }
 0x19c   : > { %880 = vst [vmem:[%s1665_s3 + $0x20] sm:$0xff] %v867_v5  ;;  %v869_v9 = vmul.f32 %v857_v41, %v775_v7 }
 0x19d   : > { %884 = vst.msk [vmem:[%s1665_s3 + $0x40] sm:$0xff] %vm877_vm11, %v871_v6  ;;  %v793_v11 = vpop.f32.mrf.mxu2  ;;  %v833_v12 = vpop.f32.mrf.mxu1 }
 0x19e   : > { %882 = vst [vmem:[%s1665_s3 + $0x30] sm:$0xff] %v869_v9  ;;  %v794_v13 = vadd.f32 %v793_v11, %v565_v44  ;;  %v834_v15 = vadd.f32 %v833_v12, %v570_v8 }
 0x19f   : > { %v757_v16 = vpop.f32.mrf.mxu0 }
 0x1a0   : > { %v813_v17 = vadd.f32 %v1658_v27, %v794_v13  ;;  %v758_v18 = vadd.f32 %v757_v16, %v570_v8  ;;  %v853_v19 = vadd.f32 %v852_v10, %v834_v15 }
 0x1a2   : > { %v870_v20 = vmul.f32 %v858_v50, %v813_v17  ;;  %v777_v21 = vadd.f32 %v1662_v30, %v758_v18  ;;  %v874_v22 = vmul.f32 %v859_v36, %v853_v19 }
 0x1a4   : > { %883 = vst [vmem:[%s1665_s3 + $0x38] sm:$0xff] %v870_v20  ;;  %v872_v23 = vmul.f32 %v857_v41, %v777_v21 }
 0x1a5   : > { %887 = vst.msk [vmem:[%s1665_s3 + $0x58] sm:$0xff] %vm877_vm11, %v874_v22  ;;  %v795_v24 = vpop.f32.mrf.mxu2 }
 0x1a6   : > { %885 = vst [vmem:[%s1665_s3 + $0x48] sm:$0xff] %v872_v23  ;;  %v796_v0 = vadd.f32 %v795_v24, %v570_v8 }
 0x1a8   : > { %v815_v25 = vadd.f32 %v1660_v29, %v796_v0 }
 0x1aa   : > { %v873_v26 = vmul.f32 %v858_v50, %v815_v25 }
 0x1ac   : > { %886 = vst [vmem:[%s1665_s3 + $0x50] sm:$0xff] %v873_v26 }
 0x1ad   : > { %1323 = shalt.err (!%p1320_p8)
}
 0x1ae   : > { %s1380_s14 = smov 384   ;;  %s1381_s11 = smov 24  }
 0x1af   : > { %1169 = dma.vmem_to_hbm [thread:$0]  (%p1459_p11), %s902_s19, 1536, %s904_s30, %s889_s5, %s1380_s14, %s1380_s14, %s1381_s11  }
 0x1b0 PF: > { %s918_s20 = sand.u32 1, %s1354_s15   ;;  %p1733_p9 = scmp.ge.s32.totalorder %s1366_s18, 2 }
 0x1b1   : > { %s919_s22 = scalar_lea.sflag [#allocation5], %s918_s20 }
 0x1b2   : > { %p1180_p10 = pnand %p1733_p9, %p1463_p12 }
 0x1b4   : > { %p1181_p1 = pneg %p1180_p10 }
 0x1b6   : > { %1349 = dma.done.wait (%p1181_p1), %s919_s22, 1536  }
 0x1b7   : > { %1351 = vsyncadd (%p1181_p1), %s919_s22, 4294965760  ;;  %p18_p2 = scmp.ge.s32.totalorder %s1432_s21, 4   ;;  %s1734_s15 = smov %s1358_s16 }
 0x1b8   : > { %s1735_s16 = smov %s1362_s17  ;;  %s1736_s17 = smov %s1444_s24 }
 0x1b9   : > { %s1737_s18 = smov %s1432_s21  ;;  %20 = sbr.rel (!%p18_p2) target bundleno = 8 (0x8), region = 85 }
 0x1be   :  { %925 = vsyncpa [#allocation4], 1 }
 0x1bf   :  { %927 = vsyncpa [#allocation4 + $0x1], 1 }
 0x1c0   :  { %928 = vsyncpa [#allocation7], 1 }
 0x1c1   :  { %929 = vsyncpa [#allocation5], 1 }
 0x1c2   :  { %931 = vsyncpa [#allocation5 + $0x1], 1 }

</bundles_post_ra>
